<compile_context>
chip_gen: v6e
topology: v6e:2x2x1
jax: 0.10.0
libtpu: 0.0.40
codegen_flags: <defaults>
</compile_context>

<pallas_src>
import jax
import jax.numpy as jnp
from jax.experimental import pallas as pl
from jax.experimental.pallas import tpu as pltpu

_LANE = 128          # lanes per vreg (last dim)
_MAX_BLOCK_ROWS = 1024   # rows per grid step; 1024*128*4B = 512 KiB / input block


def _mcc_kernel(total_ref, x_ref, t_ref, out_ref, acc_ref):
    i = pl.program_id(0)
    last = pl.num_programs(0) - 1

    block_rows, lane = x_ref.shape
    n_vregs = block_rows // 8

    @pl.when(i == 0)
    def _init():
        acc_ref[...] = jnp.zeros_like(acc_ref)

    x = jax.nn.sigmoid(x_ref[...].astype(jnp.float32))
    t = t_ref[...].astype(jnp.float32)

    def _accumulate(xv, tv):
        # (block_rows, 128) -> (block_rows//8, 8, 128): groups whole vregs, so
        # the axis-0 sum is pure vreg-wise VPU adds (no XLU work per tile).
        x3 = xv.reshape(n_vregs, 8, lane)
        t3 = tv.reshape(n_vregs, 8, lane)
        acc_ref[0] += jnp.sum(x3, axis=0)          # partial sum of sigmoid(x)
        acc_ref[1] += jnp.sum(t3, axis=0)          # partial sum of t
        acc_ref[2] += jnp.sum(x3 * t3, axis=0)     # partial sum of sigmoid(x)*t

    @pl.when(i < last)
    def _full_block():
        _accumulate(x, t)

    @pl.when(i == last)
    def _tail_block():
        # Mask only the final block: padded elements must not contribute.
        row = jax.lax.broadcasted_iota(jnp.int32, (block_rows, lane), 0)
        col = jax.lax.broadcasted_iota(jnp.int32, (block_rows, lane), 1)
        gidx = (i * block_rows + row) * lane + col
        valid = (gidx < total_ref[0]).astype(jnp.float32)
        _accumulate(x * valid, t * valid)

    @pl.when(i == last)
    def _finalize():
        n = total_ref[0].astype(jnp.float32)
        s_x = jnp.sum(acc_ref[0])
        s_t = jnp.sum(acc_ref[1])
        s_xt = jnp.sum(acc_ref[2])
        tp = s_xt
        fp = s_x - s_xt
        fn = s_t - s_xt
        tn = n - s_x - s_t + s_xt
        numerator = tp * tn - fp * fn
        denominator = jnp.sqrt((tp + fp) * (tp + fn) * (tn + fp) * (tn + fn))
        out_ref[0, 0] = 1.0 - numerator / (denominator + 1.0)


def mcc_loss(inputs, targets):
    """Pallas implementation of MCC_Loss.forward. Returns a scalar float32."""
    assert inputs.shape == targets.shape
    total = int(inputs.size)

    # Choose block rows: as many as needed (rounded to sublane multiple of 8),
    # capped at _MAX_BLOCK_ROWS.  Pad only up to a block multiple.
    rows_needed = -(-total // _LANE)
    rows_needed = -(-rows_needed // 8) * 8
    block_rows = min(_MAX_BLOCK_ROWS, max(rows_needed, 8))
    grid_n = -(-rows_needed // block_rows)
    rows = grid_n * block_rows
    padded = rows * _LANE
    pad = padded - total

    xf = inputs.reshape(-1)
    tf = targets.reshape(-1)
    if pad:
        xf = jnp.pad(xf, (0, pad))
        tf = jnp.pad(tf, (0, pad))
    x2 = xf.reshape(rows, _LANE)   # native dtype; cast happens in-kernel
    t2 = tf.reshape(rows, _LANE)

    total_arr = jnp.array([total], dtype=jnp.int32)

    tile_spec = pl.BlockSpec((block_rows, _LANE), lambda i, total_ref: (i, 0))

    out = pl.pallas_call(
        _mcc_kernel,
        out_shape=jax.ShapeDtypeStruct((1, 1), jnp.float32),
        grid_spec=pltpu.PrefetchScalarGridSpec(
            num_scalar_prefetch=1,
            grid=(grid_n,),
            in_specs=[tile_spec, tile_spec],
            out_specs=pl.BlockSpec(memory_space=pltpu.SMEM),
            scratch_shapes=[pltpu.VMEM((3, 8, _LANE), jnp.float32)],
        ),
        compiler_params=pltpu.CompilerParams(
            dimension_semantics=("arbitrary",)
        ),
    )(total_arr, x2, t2)
    return out[0, 0]


def _mcc_loss_ref(inputs, targets):
    """Pure-JAX reference mirroring the PyTorch module."""
    x = jax.nn.sigmoid(inputs.astype(jnp.float32))
    t = targets.astype(jnp.float32)
    tp = jnp.sum(x * t)
    tn = jnp.sum((1 - x) * (1 - t))
    fp = jnp.sum(x * (1 - t))
    fn = jnp.sum((1 - x) * t)
    numerator = tp * tn - fp * fn
    denominator = jnp.sqrt((tp + fp) * (tp + fn) * (tn + fp) * (tn + fn))
    return 1.0 - numerator / (denominator + 1.0)


if __name__ == "__main__":
    key = jax.random.PRNGKey(0)
    k1, k2 = jax.random.split(key)
    # NCHW-shaped logits and 1-hot targets (batch=2, channels=4, 16x16 spatial).
    inputs = jax.random.normal(k1, (2, 4, 16, 16), dtype=jnp.float32)
    targets = (jax.random.uniform(k2, (2, 4, 16, 16)) > 0.5).astype(jnp.float32)

    loss = mcc_loss(inputs, targets)
    jax.block_until_ready(loss)

    ref = _mcc_loss_ref(inputs, targets)
    assert jnp.allclose(loss, ref, atol=1e-5, rtol=1e-5), (loss, ref)

    # Also check a ragged (non-block-multiple) size to exercise the tail mask.
    k3, k4 = jax.random.split(k1)
    xi = jax.random.normal(k3, (3, 5, 7, 11), dtype=jnp.float32)
    ti = (jax.random.uniform(k4, (3, 5, 7, 11)) > 0.5).astype(jnp.float32)
    loss2 = mcc_loss(xi, ti)
    jax.block_until_ready(loss2)
    ref2 = _mcc_loss_ref(xi, ti)
    assert jnp.allclose(loss2, ref2, atol=1e-5, rtol=1e-5), (loss2, ref2)

    print("KERNEL_OK")
</pallas_src>

<mosaic_0001>
module attributes {stable_mosaic.version = 11 : i64} {
  func.func @_mcc_kernel(%arg0: i32, %arg1: memref<1xi32, #tpu.memory_space<smem>>, %arg2: memref<16x128xf32, #tpu.memory_space<vmem>>, %arg3: memref<16x128xf32, #tpu.memory_space<vmem>>, %arg4: memref<1x1xf32, #tpu.memory_space<smem>>, %arg5: memref<3x8x128xf32, #tpu.memory_space<vmem>>) attributes {dimension_semantics = [#tpu.dimension_semantics<arbitrary>], iteration_bounds = array<i64: 1>, scalar_prefetch = 1 : i64, scratch_operands = 1 : i64, tpu.core_type = #tpu.core_type<tc>, window_params = [{transform_indices = @transform_0, window_bounds = array<i64: 16, 128>}, {transform_indices = @transform_1, window_bounds = array<i64: 16, 128>}, {transform_indices = @transform_2, window_bounds = array<i64: 1, 1>}]} {
    %c0_i32 = arith.constant 0 : i32
    %0 = arith.cmpi eq, %arg0, %c0_i32 : i32
    %1 = arith.extui %0 : i1 to i32
    %c0_i32_0 = arith.constant 0 : i32
    %2 = arith.cmpi ne, %1, %c0_i32_0 : i32
    scf.if %2 {
      %cst_10 = arith.constant 0.000000e+00 : f32
      %19 = vector.broadcast %cst_10 : f32 to vector<3x8x128xf32>
      %c0_11 = arith.constant 0 : index
      %c0_12 = arith.constant 0 : index
      %c0_13 = arith.constant 0 : index
      %20 = vector.load %arg5[%c0_11, %c0_12, %c0_13] : memref<3x8x128xf32, #tpu.memory_space<vmem>>, vector<3x8x128xf32>
      tpu.vector_store %arg5[%c0_11, %c0_12, %c0_13], %19 {strides = array<i32>} : memref<3x8x128xf32, #tpu.memory_space<vmem>>, vector<3x8x128xf32>,
    } else {
    }
    %c0 = arith.constant 0 : index
    %c0_1 = arith.constant 0 : index
    %3 = vector.load %arg2[%c0, %c0_1] : memref<16x128xf32, #tpu.memory_space<vmem>>, vector<16x128xf32>
    %4 = arith.negf %3 : vector<16x128xf32>
    %5 = math.exp %4 : vector<16x128xf32>
    %cst = arith.constant 1.000000e+00 : f32
    %6 = vector.broadcast %cst : f32 to vector<16x128xf32>
    %7 = arith.addf %6, %5 : vector<16x128xf32>
    %8 = arith.divf %6, %7 : vector<16x128xf32>
    %c0_2 = arith.constant 0 : index
    %c0_3 = arith.constant 0 : index
    %9 = vector.load %arg3[%c0_2, %c0_3] : memref<16x128xf32, #tpu.memory_space<vmem>>, vector<16x128xf32>
    %c0_i32_4 = arith.constant 0 : i32
    %10 = arith.cmpi slt, %arg0, %c0_i32_4 : i32
    %11 = arith.extui %10 : i1 to i32
    %c0_i32_5 = arith.constant 0 : i32
    %12 = arith.cmpi ne, %11, %c0_i32_5 : i32
    scf.if %12 {
      %19 = vector.shape_cast %8 : vector<16x128xf32> to vector<2x8x128xf32>
      %20 = vector.shape_cast %9 : vector<16x128xf32> to vector<2x8x128xf32>
      %c0_10 = arith.constant 0 : index
      %c0_11 = arith.constant 0 : index
      %c0_12 = arith.constant 0 : index
      %21 = vector.load %arg5[%c0_10, %c0_11, %c0_12] : memref<3x8x128xf32, #tpu.memory_space<vmem>>, vector<1x8x128xf32>
      %22 = vector.shape_cast %21 : vector<1x8x128xf32> to vector<8x128xf32>
      %cst_13 = arith.constant dense<0.000000e+00> : vector<8x128xf32>
      %23 = vector.multi_reduction <add>, %19, %cst_13 [0] : vector<2x8x128xf32> to vector<8x128xf32>
      %24 = arith.addf %22, %23 : vector<8x128xf32>
      %c0_14 = arith.constant 0 : index
      %c0_15 = arith.constant 0 : index
      %c0_16 = arith.constant 0 : index
      %25 = vector.load %arg5[%c0_14, %c0_15, %c0_16] : memref<3x8x128xf32, #tpu.memory_space<vmem>>, vector<1x8x128xf32>
      %26 = vector.shape_cast %25 : vector<1x8x128xf32> to vector<8x128xf32>
      %27 = vector.shape_cast %24 : vector<8x128xf32> to vector<1x8x128xf32>
      tpu.vector_store %arg5[%c0_14, %c0_15, %c0_16], %27 {strides = array<i32>} : memref<3x8x128xf32, #tpu.memory_space<vmem>>, vector<1x8x128xf32>,
      %c1 = arith.constant 1 : index
      %c0_17 = arith.constant 0 : index
      %c0_18 = arith.constant 0 : index
      %28 = vector.load %arg5[%c1, %c0_17, %c0_18] : memref<3x8x128xf32, #tpu.memory_space<vmem>>, vector<1x8x128xf32>
      %29 = vector.shape_cast %28 : vector<1x8x128xf32> to vector<8x128xf32>
      %cst_19 = arith.constant dense<0.000000e+00> : vector<8x128xf32>
      %30 = vector.multi_reduction <add>, %20, %cst_19 [0] : vector<2x8x128xf32> to vector<8x128xf32>
      %31 = arith.addf %29, %30 : vector<8x128xf32>
      %c1_20 = arith.constant 1 : index
      %c0_21 = arith.constant 0 : index
      %c0_22 = arith.constant 0 : index
      %32 = vector.load %arg5[%c1_20, %c0_21, %c0_22] : memref<3x8x128xf32, #tpu.memory_space<vmem>>, vector<1x8x128xf32>
      %33 = vector.shape_cast %32 : vector<1x8x128xf32> to vector<8x128xf32>
      %34 = vector.shape_cast %31 : vector<8x128xf32> to vector<1x8x128xf32>
      tpu.vector_store %arg5[%c1_20, %c0_21, %c0_22], %34 {strides = array<i32>} : memref<3x8x128xf32, #tpu.memory_space<vmem>>, vector<1x8x128xf32>,
      %c2 = arith.constant 2 : index
      %c0_23 = arith.constant 0 : index
      %c0_24 = arith.constant 0 : index
      %35 = vector.load %arg5[%c2, %c0_23, %c0_24] : memref<3x8x128xf32, #tpu.memory_space<vmem>>, vector<1x8x128xf32>
      %36 = vector.shape_cast %35 : vector<1x8x128xf32> to vector<8x128xf32>
      %37 = arith.mulf %19, %20 : vector<2x8x128xf32>
      %cst_25 = arith.constant dense<0.000000e+00> : vector<8x128xf32>
      %38 = vector.multi_reduction <add>, %37, %cst_25 [0] : vector<2x8x128xf32> to vector<8x128xf32>
      %39 = arith.addf %36, %38 : vector<8x128xf32>
      %c2_26 = arith.constant 2 : index
      %c0_27 = arith.constant 0 : index
      %c0_28 = arith.constant 0 : index
      %40 = vector.load %arg5[%c2_26, %c0_27, %c0_28] : memref<3x8x128xf32, #tpu.memory_space<vmem>>, vector<1x8x128xf32>
      %41 = vector.shape_cast %40 : vector<1x8x128xf32> to vector<8x128xf32>
      %42 = vector.shape_cast %39 : vector<8x128xf32> to vector<1x8x128xf32>
      tpu.vector_store %arg5[%c2_26, %c0_27, %c0_28], %42 {strides = array<i32>} : memref<3x8x128xf32, #tpu.memory_space<vmem>>, vector<1x8x128xf32>,
    } else {
    }
    %c0_i32_6 = arith.constant 0 : i32
    %13 = arith.cmpi eq, %arg0, %c0_i32_6 : i32
    %14 = arith.extui %13 : i1 to i32
    %c0_i32_7 = arith.constant 0 : i32
    %15 = arith.cmpi ne, %14, %c0_i32_7 : i32
    scf.if %15 {
      %19 = tpu.iota {dimensions = array<i32: 0>} : vector<16x128xi32>
      %20 = tpu.iota {dimensions = array<i32: 1>} : vector<16x128xi32>
      %c16_i32 = arith.constant 16 : i32
      %21 = arith.muli %arg0, %c16_i32 : i32
      %22 = vector.broadcast %21 : i32 to vector<16x128xi32>
      %23 = arith.addi %22, %19 : vector<16x128xi32>
      %c128_i32 = arith.constant 128 : i32
      %24 = vector.broadcast %c128_i32 : i32 to vector<16x128xi32>
      %25 = arith.muli %23, %24 : vector<16x128xi32>
      %26 = arith.addi %25, %20 : vector<16x128xi32>
      %c0_10 = arith.constant 0 : index
      %27 = memref.load %arg1[%c0_10] : memref<1xi32, #tpu.memory_space<smem>>
      %28 = vector.broadcast %27 : i32 to vector<16x128xi32>
      %29 = arith.cmpi slt, %26, %28 : vector<16x128xi32>
      %30 = arith.extui %29 : vector<16x128xi1> to vector<16x128xi32>
      %31 = arith.sitofp %30 : vector<16x128xi32> to vector<16x128xf32>
      %32 = arith.mulf %8, %31 : vector<16x128xf32>
      %33 = arith.mulf %9, %31 : vector<16x128xf32>
      %34 = vector.shape_cast %32 : vector<16x128xf32> to vector<2x8x128xf32>
      %35 = vector.shape_cast %33 : vector<16x128xf32> to vector<2x8x128xf32>
      %c0_11 = arith.constant 0 : index
      %c0_12 = arith.constant 0 : index
      %c0_13 = arith.constant 0 : index
      %36 = vector.load %arg5[%c0_11, %c0_12, %c0_13] : memref<3x8x128xf32, #tpu.memory_space<vmem>>, vector<1x8x128xf32>
      %37 = vector.shape_cast %36 : vector<1x8x128xf32> to vector<8x128xf32>
      %cst_14 = arith.constant dense<0.000000e+00> : vector<8x128xf32>
      %38 = vector.multi_reduction <add>, %34, %cst_14 [0] : vector<2x8x128xf32> to vector<8x128xf32>
      %39 = arith.addf %37, %38 : vector<8x128xf32>
      %c0_15 = arith.constant 0 : index
      %c0_16 = arith.constant 0 : index
      %c0_17 = arith.constant 0 : index
      %40 = vector.load %arg5[%c0_15, %c0_16, %c0_17] : memref<3x8x128xf32, #tpu.memory_space<vmem>>, vector<1x8x128xf32>
      %41 = vector.shape_cast %40 : vector<1x8x128xf32> to vector<8x128xf32>
      %42 = vector.shape_cast %39 : vector<8x128xf32> to vector<1x8x128xf32>
      tpu.vector_store %arg5[%c0_15, %c0_16, %c0_17], %42 {strides = array<i32>} : memref<3x8x128xf32, #tpu.memory_space<vmem>>, vector<1x8x128xf32>,
      %c1 = arith.constant 1 : index
      %c0_18 = arith.constant 0 : index
      %c0_19 = arith.constant 0 : index
      %43 = vector.load %arg5[%c1, %c0_18, %c0_19] : memref<3x8x128xf32, #tpu.memory_space<vmem>>, vector<1x8x128xf32>
      %44 = vector.shape_cast %43 : vector<1x8x128xf32> to vector<8x128xf32>
      %cst_20 = arith.constant dense<0.000000e+00> : vector<8x128xf32>
      %45 = vector.multi_reduction <add>, %35, %cst_20 [0] : vector<2x8x128xf32> to vector<8x128xf32>
      %46 = arith.addf %44, %45 : vector<8x128xf32>
      %c1_21 = arith.constant 1 : index
      %c0_22 = arith.constant 0 : index
      %c0_23 = arith.constant 0 : index
      %47 = vector.load %arg5[%c1_21, %c0_22, %c0_23] : memref<3x8x128xf32, #tpu.memory_space<vmem>>, vector<1x8x128xf32>
      %48 = vector.shape_cast %47 : vector<1x8x128xf32> to vector<8x128xf32>
      %49 = vector.shape_cast %46 : vector<8x128xf32> to vector<1x8x128xf32>
      tpu.vector_store %arg5[%c1_21, %c0_22, %c0_23], %49 {strides = array<i32>} : memref<3x8x128xf32, #tpu.memory_space<vmem>>, vector<1x8x128xf32>,
      %c2 = arith.constant 2 : index
      %c0_24 = arith.constant 0 : index
      %c0_25 = arith.constant 0 : index
      %50 = vector.load %arg5[%c2, %c0_24, %c0_25] : memref<3x8x128xf32, #tpu.memory_space<vmem>>, vector<1x8x128xf32>
      %51 = vector.shape_cast %50 : vector<1x8x128xf32> to vector<8x128xf32>
      %52 = arith.mulf %34, %35 : vector<2x8x128xf32>
      %cst_26 = arith.constant dense<0.000000e+00> : vector<8x128xf32>
      %53 = vector.multi_reduction <add>, %52, %cst_26 [0] : vector<2x8x128xf32> to vector<8x128xf32>
      %54 = arith.addf %51, %53 : vector<8x128xf32>
      %c2_27 = arith.constant 2 : index
      %c0_28 = arith.constant 0 : index
      %c0_29 = arith.constant 0 : index
      %55 = vector.load %arg5[%c2_27, %c0_28, %c0_29] : memref<3x8x128xf32, #tpu.memory_space<vmem>>, vector<1x8x128xf32>
      %56 = vector.shape_cast %55 : vector<1x8x128xf32> to vector<8x128xf32>
      %57 = vector.shape_cast %54 : vector<8x128xf32> to vector<1x8x128xf32>
      tpu.vector_store %arg5[%c2_27, %c0_28, %c0_29], %57 {strides = array<i32>} : memref<3x8x128xf32, #tpu.memory_space<vmem>>, vector<1x8x128xf32>,
    } else {
    }
    %c0_i32_8 = arith.constant 0 : i32
    %16 = arith.cmpi eq, %arg0, %c0_i32_8 : i32
    %17 = arith.extui %16 : i1 to i32
    %c0_i32_9 = arith.constant 0 : i32
    %18 = arith.cmpi ne, %17, %c0_i32_9 : i32
    scf.if %18 {
      %c0_10 = arith.constant 0 : index
      %19 = memref.load %arg1[%c0_10] : memref<1xi32, #tpu.memory_space<smem>>
      %20 = arith.sitofp %19 : i32 to f32
      %c0_11 = arith.constant 0 : index
      %c0_12 = arith.constant 0 : index
      %c0_13 = arith.constant 0 : index
      %21 = vector.load %arg5[%c0_11, %c0_12, %c0_13] : memref<3x8x128xf32, #tpu.memory_space<vmem>>, vector<1x8x128xf32>
      %22 = vector.shape_cast %21 : vector<1x8x128xf32> to vector<8x128xf32>
      %23 = vector.shape_cast %22 : vector<8x128xf32> to vector<1x8x128xf32>
      %cst_14 = arith.constant dense<0.000000e+00> : vector<1xf32>
      %24 = vector.multi_reduction <add>, %23, %cst_14 [1, 2] : vector<1x8x128xf32> to vector<1xf32>
      %25 = vector.shape_cast %24 : vector<1xf32> to vector<1x1x1xf32>
      %26 = vector.extract %25[0, 0, 0] : f32 from vector<1x1x1xf32>
      %c1 = arith.constant 1 : index
      %c0_15 = arith.constant 0 : index
      %c0_16 = arith.constant 0 : index
      %27 = vector.load %arg5[%c1, %c0_15, %c0_16] : memref<3x8x128xf32, #tpu.memory_space<vmem>>, vector<1x8x128xf32>
      %28 = vector.shape_cast %27 : vector<1x8x128xf32> to vector<8x128xf32>
      %29 = vector.shape_cast %28 : vector<8x128xf32> to vector<1x8x128xf32>
      %cst_17 = arith.constant dense<0.000000e+00> : vector<1xf32>
      %30 = vector.multi_reduction <add>, %29, %cst_17 [1, 2] : vector<1x8x128xf32> to vector<1xf32>
      %31 = vector.shape_cast %30 : vector<1xf32> to vector<1x1x1xf32>
      %32 = vector.extract %31[0, 0, 0] : f32 from vector<1x1x1xf32>
      %c2 = arith.constant 2 : index
      %c0_18 = arith.constant 0 : index
      %c0_19 = arith.constant 0 : index
      %33 = vector.load %arg5[%c2, %c0_18, %c0_19] : memref<3x8x128xf32, #tpu.memory_space<vmem>>, vector<1x8x128xf32>
      %34 = vector.shape_cast %33 : vector<1x8x128xf32> to vector<8x128xf32>
      %35 = vector.shape_cast %34 : vector<8x128xf32> to vector<1x8x128xf32>
      %cst_20 = arith.constant dense<0.000000e+00> : vector<1xf32>
      %36 = vector.multi_reduction <add>, %35, %cst_20 [1, 2] : vector<1x8x128xf32> to vector<1xf32>
      %37 = vector.shape_cast %36 : vector<1xf32> to vector<1x1x1xf32>
      %38 = vector.extract %37[0, 0, 0] : f32 from vector<1x1x1xf32>
      %39 = arith.subf %26, %38 : f32
      %40 = arith.subf %32, %38 : f32
      %41 = arith.subf %20, %26 : f32
      %42 = arith.subf %41, %32 : f32
      %43 = arith.addf %42, %38 : f32
      %44 = arith.mulf %38, %43 : f32
      %45 = arith.mulf %39, %40 : f32
      %46 = arith.subf %44, %45 : f32
      %47 = arith.addf %38, %39 : f32
      %48 = arith.addf %38, %40 : f32
      %49 = arith.mulf %47, %48 : f32
      %50 = arith.addf %43, %39 : f32
      %51 = arith.mulf %49, %50 : f32
      %52 = arith.addf %43, %40 : f32
      %53 = arith.mulf %51, %52 : f32
      %54 = math.sqrt %53 : f32
      %cst_21 = arith.constant 1.000000e+00 : f32
      %55 = arith.addf %54, %cst_21 : f32
      %56 = arith.divf %46, %55 : f32
      %cst_22 = arith.constant 1.000000e+00 : f32
      %57 = arith.subf %cst_22, %56 : f32
      %c0_23 = arith.constant 0 : index
      %c0_24 = arith.constant 0 : index
      %58 = memref.load %arg4[%c0_23, %c0_24] : memref<1x1xf32, #tpu.memory_space<smem>>
      memref.store %57, %arg4[%c0_23, %c0_24] : memref<1x1xf32, #tpu.memory_space<smem>>
    } else {
    }
    return
  }
  func.func @transform_0(%arg0: i32, %arg1: memref<1xi32, #tpu.memory_space<smem>>) -> (i32, i32) {
    %c0_i32 = arith.constant 0 : i32
    %c0_i32_0 = arith.constant 0 : i32
    return %arg0, %c0_i32 : i32, i32
  }
  func.func @transform_1(%arg0: i32, %arg1: memref<1xi32, #tpu.memory_space<smem>>) -> (i32, i32) {
    %c0_i32 = arith.constant 0 : i32
    %c0_i32_0 = arith.constant 0 : i32
    return %arg0, %c0_i32 : i32, i32
  }
  func.func @transform_2(%arg0: i32, %arg1: memref<1xi32, #tpu.memory_space<smem>>) -> (i32, i32) {
    %c0_i32 = arith.constant 0 : i32
    %c0_i32_0 = arith.constant 0 : i32
    %c0_i32_1 = arith.constant 0 : i32
    return %c0_i32, %c0_i32_0 : i32, i32
  }
}

</mosaic_0001>

<bundles_post_ra>
// kernel: tpu_custom_call.1
= control target key start
LH: loop header
LB: loop body
LE: loop exit
PB: predicated region body
PF: predicated region fallthrough
CT: control target
= control target key end

     0   :  { %9 = vsyncpa [#allocation6], 0  ;;  %s335_s0 = inlined_call_operand.<no memory space> [shape: s32[1], index: 0, kind: input, shape index: {}]   ;;  %s336_s1 = inlined_call_operand.hbm [shape: f32[16,128], index: 1, kind: input, shape index: {}]   ;;  %s337_s2 = inlined_call_operand.hbm [shape: f32[16,128], index: 2, kind: input, shape index: {}]   ;;  %s338_s3 = inlined_call_operand.hbm [shape: f32[1,1], index: 3, kind: output, shape index: {}]  }
   0x1   :  { %10 = vsyncpa [#allocation9], 0 }
   0x2   :  { %11 = vsyncpa [#allocation7], 0  ;;  %s294_s12 = smov [#allocation5]  }
   0x3   :  { %s17_s13 = sshll.u32 %s294_s12, 4  ;;  %s18_s13 = int_to_ptr.vmem [resolvable:$true] %s17_s13 }
   0x4   :  { %s248_s14 = scalar_lea.vmem %s18_s13, 256  ;;  %p253_p1 = scmp.lt.s32.totalorder %s18_s13, %s18_s13 }
   0x5   :  { %p249_p0 = scmp.ne.s32.totalorder %s18_s13, %s248_s14  ;;  %p254_p2 = scmp.lt.s32.totalorder %s248_s14, %s248_s14 }
   0x7   :  { %p255_p3 = por %p254_p2, %p253_p1 }
   0x9   :  { %p256_p4 = pnand %p255_p3, %p249_p0 }
   0xb   :  { %259 = shalt.err (!%p256_p4)
}
   0xc   :  { %s295_s15 = smov 128   ;;  %s296_s16 = smov 8  }
   0xd   :  { %23 = dma.hbm_to_vmem [thread:$0]  %s336_s1, 256, %s18_s13, [#allocation6], %s295_s15, %s295_s15, %s296_s16  }
   0xe   :  { %s297_s19 = smov [#allocation8]  }
   0xf   :  { %s29_s20 = sshll.u32 %s297_s19, 4  ;;  %s30_s20 = int_to_ptr.vmem [resolvable:$true] %s29_s20 }
  0x10   :  { %s268_s21 = scalar_lea.vmem %s30_s20, 256  ;;  %p273_p6 = scmp.lt.s32.totalorder %s30_s20, %s30_s20 }
  0x11   :  { %p269_p5 = scmp.ne.s32.totalorder %s30_s20, %s268_s21  ;;  %p274_p7 = scmp.lt.s32.totalorder %s268_s21, %s268_s21 }
  0x13   :  { %p275_p8 = por %p274_p7, %p273_p6 }
  0x15   :  { %p276_p9 = pnand %p275_p8, %p269_p5 }
  0x17   :  { %279 = shalt.err (!%p276_p9)
}
  0x18   :  { %35 = dma.hbm_to_vmem [thread:$0]  %s337_s2, 256, %s30_s20, [#allocation9], %s295_s15, %s295_s15, %s296_s16  }
  0x19   :  { %288 = dma.done.wait [#allocation6], 256  }
  0x1a   :  { %289 = vsyncadd [#allocation6], 4294967040 }
  0x1b   :  { %290 = dma.done.wait [#allocation9], 256  }
  0x1c   :  { %291 = vsyncadd [#allocation9], 4294967040  ;;  %v49_v0 = vld [vmem:[#allocation5] sm:$0xff]  ;;  %v50_v1 = vld [vmem:[#allocation5 + $0x8] sm:$0xff]  ;;  %v88_v4 = vlaneseq  ;;  %v102_v16 = vstv %s335_s0  ;;  %v298_v17 = vmov 0.0   ;;  %s130_s26 = scvt.s32.f32 %s335_s0  ;;  %s299_s22 = smov [#allocation10]  }
  0x1d   :  { %v208_v2 = vmul.f32 -1.442695, %v49_v0  ;;  %v209_v3 = vmul.f32 -1.442695, %v50_v1  ;;  %v63_v19 = vld [vmem:[#allocation8] sm:$0xff]  ;;  %v64_v21 = vld [vmem:[#allocation8 + $0x8] sm:$0xff] }
  0x1e   :  { %v89_v5 = vshrl.u32 %v88_v4, 7  ;;  %v92_v10 = vand.u32 127, %v88_v4 }
  0x1f   :  { %228 = vpow2.f32 %v208_v2 }
  0x20   :  { %230 = vpow2.f32 %v209_v3  ;;  %v90_v6 = vadd.s32 8, %v89_v5  ;;  %v97_v11 = vmul.u32 128, %v89_v5 }
  0x22   :  { %v98_v13 = vmul.u32 128, %v90_v6  ;;  %v99_v14 = vadd.s32 %v97_v11, %v92_v10 }
  0x24   :  { %v100_v15 = vadd.s32 %v98_v13, %v92_v10  ;;  %vm103_vm0 = vcmp.lt.s32.totalorder %v99_v14, %v102_v16 }
  0x25   :  { %v210_v18 = vsel %vm103_vm0, 1.0, %v298_v17 }
  0x26   :  { %vm104_vm1 = vcmp.lt.s32.totalorder %v100_v15, %v102_v16  ;;  %v111_v22 = vmul.f32 %v210_v18, %v63_v19 }
  0x27   :  { %v211_v20 = vsel %vm104_vm1, 1.0, %v298_v17 }
  0x28   :  { %v112_v24 = vmul.f32 %v211_v20, %v64_v21 }
  0x2a   :  { %v119_v32 = vadd.f32 %v112_v24, %v111_v22 }
  0x2c   :  { %v229_v7 = vpop.eup %228 }
  0x2d   :  { %v231_v8 = vpop.eup %230  ;;  %v57_v9 = vadd.f32 1.0, %v229_v7 }
  0x2e   :  { %v58_v12 = vadd.f32 1.0, %v231_v8 }
  0x2f   :  { %232 = vrcp.f32 %v57_v9 }
  0x30   :  { %234 = vrcp.f32 %v58_v12 }
  0x3c   :  { %v233_v23 = vpop.eup %232 }
  0x3d   :  { %v235_v25 = vpop.eup %234  ;;  %v109_v26 = vmul.f32 %v233_v23, %v210_v18 }
  0x3e   :  { %v110_v27 = vmul.f32 %v235_v25, %v211_v20 }
  0x3f   :  { %v124_v28 = vmul.f32 %v111_v22, %v109_v26 }
  0x40   :  { %v114_v29 = vadd.f32 %v110_v27, %v109_v26  ;;  %v125_v30 = vmul.f32 %v112_v24, %v110_v27 }
  0x42   :  { %132 = vadd.xlane.f32.xlu0 %v114_v29  ;;  %v126_v31 = vadd.f32 %v125_v30, %v124_v28 }
  0x44   :  { %152 = vadd.xlane.f32.xlu1 %v126_v31 }
  0x46   :  { %142 = vadd.xlane.f32.xlu0 %v119_v32 }
  0xcb   :  { %v133_v33 = vpop.xlane.xlu0 %132 }
  0xcc   :  { %v134_v34 = vrot.slane %v133_v33, 4 }
  0xcd   :  { %v153_v35 = vpop.xlane.xlu1 %152 }
  0xce   :  { %v135_v36 = vadd.f32 %v134_v34, %v133_v33  ;;  %v154_v37 = vrot.slane %v153_v35, 4 }
  0xcf   :  { %v143_v38 = vpop.xlane.xlu0 %142 }
  0xd0   :  { %v136_v39 = vrot.slane %v135_v36, 2  ;;  %v155_v40 = vadd.f32 %v154_v37, %v153_v35  ;;  %v144_v41 = vrot.slane %v143_v38, 4 }
  0xd2   :  { %v156_v42 = vrot.slane %v155_v40, 2  ;;  %v145_v43 = vadd.f32 %v144_v41, %v143_v38  ;;  %v137_v44 = vadd.f32 %v136_v39, %v135_v36 }
  0xd4   :  { %v157_v45 = vadd.f32 %v156_v42, %v155_v40  ;;  %v146_v46 = vrot.slane %v145_v43, 2  ;;  %v138_v47 = vrot.slane %v137_v44, 1 }
  0xd6   :  { %v147_v48 = vadd.f32 %v146_v46, %v145_v43  ;;  %v139_v49 = vadd.f32 %v138_v47, %v137_v44  ;;  %v158_v50 = vrot.slane %v157_v45, 1 }
  0xd8   :  { %212 = vpush %v139_v49  ;;  %v148_v51 = vrot.slane %v147_v48, 1  ;;  %v159_v53 = vadd.f32 %v158_v50, %v157_v45 }
  0xda   :  { %v149_v52 = vadd.f32 %v148_v51, %v147_v48 }
  0xdc   :  { %214 = vpush %v149_v52 }
  0xdd   :  { %216 = vpush %v159_v53 }
 0x109   :  { %s213_s27 = spop %212 }
 0x10a   :  { %s163_s28 = ssub.f32 %s130_s26, %s213_s27 }
 0x10d   :  { %s215_s29 = spop %214 }
 0x10e   :  { %s164_s30 = ssub.f32 %s163_s28, %s215_s29  ;;  %s217_s4 = spop %216 }
 0x10f   :  { %s161_s5 = ssub.f32 %s213_s27, %s217_s4 }
 0x110   :  { %s162_s6 = ssub.f32 %s215_s29, %s217_s4 }
 0x111   :  { %s165_s7 = sadd.f32 %s217_s4, %s164_s30 }
 0x112   :  { %s169_s8 = sadd.f32 %s217_s4, %s161_s5  ;;  %s167_s9 = smul.f32 %s162_s6, %s161_s5 }
 0x113   :  { %s170_s10 = sadd.f32 %s217_s4, %s162_s6  ;;  %s166_s11 = smul.f32 %s217_s4, %s165_s7 }
 0x114   :  { %s172_s12 = sadd.f32 %s165_s7, %s161_s5 }
 0x115   :  { %s171_s13 = smul.f32 %s170_s10, %s169_s8  ;;  %s168_s14 = ssub.f32 %s166_s11, %s167_s9 }
 0x116   :  { %s174_s16 = sadd.f32 %s165_s7, %s162_s6 }
 0x117   :  { %s173_s15 = smul.f32 %s172_s12, %s171_s13 }
 0x119   :  { %s175_s17 = smul.f32 %s174_s16, %s173_s15 }
 0x11b   :  { %v176_v54 = vstv %s175_s17 }
 0x11c   :  { %236 = vrsqrt.f32 %v176_v54  ;;  %vm179_vm2 = vcmp.eq.f32.partialorder %v176_v54, inf  ;;  %v182_v57 = vand.u32 2147483648, %v176_v54  ;;  %vm181_vm3 = vcmp.eq.f32.partialorder %v176_v54, 0.0 }
 0x129   :  { %v237_v55 = vpop.eup %236 }
 0x12a   :  { %v178_v56 = vmul.f32 %v237_v55, %v176_v54 }
 0x12c   :  { %v180_v58 = vsel %vm179_vm2, %v176_v54, %v178_v56 }
 0x12d   :  { %v183_v59 = vsel %vm181_vm3, %v182_v57, %v180_v58 }
 0x12e   :  { %218 = vpush %v183_v59 }
 0x15f   :  { %s219_s0 = spop %218 }
 0x160   :  { %s185_s18 = sadd.f32 1.0, %s219_s0 }
 0x162   :  { %v186_v60 = vstv %s185_s18 }
 0x163   :  { %238 = vrcp.f32 %v186_v60 }
 0x170   :  { %v239_v61 = vpop.eup %238 }
 0x171   :  { %220 = vpush %v239_v61 }
 0x1a2   :  { %s221_s19 = spop %220 }
 0x1a3   :  { %s189_s20 = smul.f32 %s221_s19, %s168_s14 }
 0x1a5   :  { %s190_s21 = ssub.f32 1.0, %s189_s20 }
 0x1a7   :  { %192 = sst [smem:[#allocation10]] %s190_s21 }
 0x1a8   :  { %200 = dma.smem_to_hbm %s299_s22, 16, %s338_s3, [#allocation7]  }
 0x1a9   :  { %292 = dma.done.wait [#allocation7], 16  }
 0x1aa   :  { %293 = vsyncadd [#allocation7], 4294967280 }
 0x1ab   :  { %204 = sfence }
 0x1ac   :  { %205 = vsyncpa [#allocation6], 1 }
 0x1ad   :  { %206 = vsyncpa [#allocation9], 1 }
 0x1ae   :  { %207 = vsyncpa [#allocation7], 1 }

</bundles_post_ra>
